<compile_context>
chip_gen: v7x
topology: tpu7x:2x2x1
jax: 0.10.0
libtpu: 0.0.40
codegen_flags: <defaults>
</compile_context>

<pallas_src>
import jax
import jax.numpy as jnp
from jax.experimental import pallas as pl
from jax.experimental.pallas import tpu as pltpu


# ----------------------------------------------------------------------------
# Fused forward kernel (single grid step, everything resident in VMEM).
# ----------------------------------------------------------------------------
def _make_fused_kernel(num_layers, num_bases):
    L = num_layers
    B = num_bases

    def kernel(*refs):
        idx = 0
        x_ref = refs[idx]; idx += 1
        conv_refs = []
        for _ in range(L):
            conv_refs.append(refs[idx:idx + 4])   # adj_basis, basis, w_root, bias
            idx += 4
        sel_u_ref = refs[idx]; sel_i_ref = refs[idx + 1]; idx += 2
        w1_u_refs = refs[idx:idx + L]; idx += L
        w1_i_refs = refs[idx:idx + L]; idx += L
        b1_ref = refs[idx]; w2_ref = refs[idx + 1]; b2_ref = refs[idx + 2]; idx += 3
        o_ref = refs[idx]

        h = x_ref[...]                                   # [N, F_in] f32
        z_u = None                                       # accumulates lin1 user half
        z_i = None                                       # accumulates lin1 item half
        for l in range(L):
            adjb_ref, basis_ref, wroot_ref, bias_ref = conv_refs[l]
            # RGCN layer: acc = X @ W_root + bias + sum_b A'_b @ X @ B_b
            acc = (
                jnp.dot(h, wroot_ref[...], preferred_element_type=jnp.float32)
                + bias_ref[...]
            )
            for b in range(B):
                msg = jnp.dot(adjb_ref[b], h, preferred_element_type=jnp.float32)
                acc = acc + jnp.dot(
                    msg, basis_ref[b], preferred_element_type=jnp.float32
                )
            h = jnp.tanh(acc)                            # [N, hidden_l]

            # Fold this layer's contribution to lin1 (fused concat + lin1):
            zu_l = jnp.dot(h, w1_u_refs[l][...], preferred_element_type=jnp.float32)
            zi_l = jnp.dot(h, w1_i_refs[l][...], preferred_element_type=jnp.float32)
            z_u = zu_l if z_u is None else z_u + zu_l    # [N, emb]
            z_i = zi_l if z_i is None else z_i + zi_l    # [N, emb]

        # Gather user/item rows via one-hot selection matmuls + relu(lin1).
        hmid = (
            jnp.dot(sel_u_ref[...], z_u, preferred_element_type=jnp.float32)
            + jnp.dot(sel_i_ref[...], z_i, preferred_element_type=jnp.float32)
            + b1_ref[...]
        )
        hmid = jnp.maximum(hmid, 0.0)                    # [B_pad, emb]
        # TODO(synk): adj_dropout / F.dropout are training-only; eval forward is identity.

        # lin2 as a VPU/XLU reduction (avoids an N=1 MXU matmul).
        pred = jnp.sum(hmid * w2_ref[...], axis=-1, keepdims=True) + b2_ref[...]
        # Lane-dense unmasked store: broadcast the prediction column across lanes.
        o_ref[...] = jnp.broadcast_to(pred, o_ref.shape).astype(o_ref.dtype)

    return kernel


def _full_spec(shape):
    nd = len(shape)
    return pl.BlockSpec(tuple(shape), lambda i, _nd=nd: (0,) * _nd)


# ----------------------------------------------------------------------------
# Parameter init (deterministic, matches IGMC.__init__ shapes) and forward.
# ----------------------------------------------------------------------------
def init_igmc_params(key, hidden_sizes, final_emb_size=128, num_relations=5,
                     num_bases=2, num_features=4):
    params = {"convs": []}
    dims = [num_features] + list(hidden_sizes)
    for i in range(len(hidden_sizes)):
        key, k1, k2, k3, k4 = jax.random.split(key, 5)
        fin, fout = dims[i], dims[i + 1]
        params["convs"].append(dict(
            basis=jax.random.normal(k1, (num_bases, fin, fout), jnp.float32) * 0.1,
            comp=jax.random.normal(k2, (num_relations, num_bases), jnp.float32) * 0.1,
            w_root=jax.random.normal(k3, (fin, fout), jnp.float32) * 0.1,
            bias=jax.random.normal(k4, (1, fout), jnp.float32) * 0.01,
        ))
    key, k1, k2, k3, k4 = jax.random.split(key, 5)
    lin1_in = 2 * sum(hidden_sizes)  # num_side_features == 0 (defaults)
    params["w1"] = jax.random.normal(k1, (lin1_in, final_emb_size), jnp.float32) * 0.05
    params["b1"] = jax.random.normal(k2, (1, final_emb_size), jnp.float32) * 0.01
    params["w2"] = jax.random.normal(k3, (final_emb_size, 1), jnp.float32) * 0.05
    params["b2"] = jax.random.normal(k4, (1, 1), jnp.float32) * 0.01
    return params


def igmc_forward(params, x, adj, user_idx, item_idx):
    n, _ = x.shape
    num_graphs = int(user_idx.shape[0])
    b_pad = max(8, ((num_graphs + 7) // 8) * 8)          # sublane-pad the batch
    convs = params["convs"]
    L = len(convs)
    hidden_sizes = [int(c["w_root"].shape[1]) for c in convs]
    s_hidden = sum(hidden_sizes)
    num_bases = int(convs[0]["basis"].shape[0])

    inputs, specs = [], []

    def add(a):
        inputs.append(a)
        specs.append(_full_spec(a.shape))

    add(x)
    for conv in convs:
        # Fold relation coefficients into the (already mean-normalized)
        # adjacency:  A'_b = sum_r comp[r, b] * A_r   (exact for basis decomp).
        adj_basis = jnp.einsum("rb,rnm->bnm", conv["comp"], adj)
        add(adj_basis)
        add(conv["basis"])
        add(conv["w_root"])
        add(conv["bias"])

    # One-hot, order-preserving selection of user / item rows (padded to b_pad).
    sel_u = jnp.pad(jax.nn.one_hot(user_idx, n, dtype=jnp.float32),
                    ((0, b_pad - num_graphs), (0, 0)))
    sel_i = jnp.pad(jax.nn.one_hot(item_idx, n, dtype=jnp.float32),
                    ((0, b_pad - num_graphs), (0, 0)))
    add(sel_u)
    add(sel_i)

    # Split lin1 weight into per-layer user / item row blocks (fuses the concat).
    w1 = params["w1"]
    off = 0
    w1_u_blocks, w1_i_blocks = [], []
    for hs in hidden_sizes:
        w1_u_blocks.append(w1[off:off + hs])
        w1_i_blocks.append(w1[s_hidden + off:s_hidden + off + hs])
        off += hs
    for w in w1_u_blocks:
        add(w)
    for w in w1_i_blocks:
        add(w)

    add(params["b1"])
    add(params["w2"].T)          # [1, emb] row for the VPU reduction
    add(params["b2"])

    kernel = _make_fused_kernel(L, num_bases)
    out = pl.pallas_call(
        kernel,
        out_shape=jax.ShapeDtypeStruct((b_pad, 128), jnp.float32),
        grid_spec=pltpu.PrefetchScalarGridSpec(
            num_scalar_prefetch=0,
            grid=(1,),
            in_specs=specs,
            out_specs=_full_spec((b_pad, 128)),
        ),
        compiler_params=pltpu.CompilerParams(
            dimension_semantics=("arbitrary",),
        ),
    )(*inputs)
    return out[:num_graphs, 0]


if __name__ == "__main__":
    key = jax.random.PRNGKey(0)

    num_graphs = 4        # one target user node + one target item node per graph
    N = 16                # total nodes in the batched sub-graphs
    num_features = 4
    num_relations = 5
    num_bases = 2
    hidden_sizes = [32, 32]
    final_emb_size = 128
    num_edges = 48

    # Node features: one-hot structural labels. First `num_graphs` nodes are
    # users (label 0 -> x[:,0]==1), next `num_graphs` are items (label 1).
    labels = jnp.concatenate([
        jnp.zeros((num_graphs,), jnp.int32),
        jnp.ones((num_graphs,), jnp.int32),
        2 + (jnp.arange(N - 2 * num_graphs) % (num_features - 2)),
    ])
    x = jax.nn.one_hot(labels, num_features, dtype=jnp.float32)

    key, ke1, ke2, ke3, kp = jax.random.split(key, 5)
    src = jax.random.randint(ke1, (num_edges,), 0, N)
    dst = jax.random.randint(ke2, (num_edges,), 0, N)
    edge_type = jax.random.randint(ke3, (num_edges,), 0, num_relations)

    # Dense relational adjacency with per-relation mean aggregation
    # (matches PyG RGCNConv aggr='mean', flow src -> dst).
    adj = jnp.zeros((num_relations, N, N), jnp.float32)
    adj = adj.at[edge_type, dst, src].add(1.0)
    deg = adj.sum(axis=2, keepdims=True)
    adj = adj / jnp.maximum(deg, 1.0)

    user_idx = jnp.arange(num_graphs)                 # rows where x[:,0]==1
    item_idx = num_graphs + jnp.arange(num_graphs)    # rows where x[:,1]==1

    params = init_igmc_params(
        kp, hidden_sizes, final_emb_size=final_emb_size,
        num_relations=num_relations, num_bases=num_bases,
        num_features=num_features)

    out = igmc_forward(params, x, adj, user_idx, item_idx)
    jax.block_until_ready(out)
    assert out.shape == (num_graphs,)
    print("KERNEL_OK")
</pallas_src>

<mosaic_0001>
module attributes {stable_mosaic.version = 11 : i64} {
  func.func @kernel(%arg0: i32, %arg1: memref<16x4xf32, #tpu.memory_space<vmem>>, %arg2: memref<2x16x16xf32, #tpu.memory_space<vmem>>, %arg3: memref<2x4x32xf32, #tpu.memory_space<vmem>>, %arg4: memref<4x32xf32, #tpu.memory_space<vmem>>, %arg5: memref<1x32xf32, #tpu.memory_space<vmem>>, %arg6: memref<2x16x16xf32, #tpu.memory_space<vmem>>, %arg7: memref<2x32x32xf32, #tpu.memory_space<vmem>>, %arg8: memref<32x32xf32, #tpu.memory_space<vmem>>, %arg9: memref<1x32xf32, #tpu.memory_space<vmem>>, %arg10: memref<8x16xf32, #tpu.memory_space<vmem>>, %arg11: memref<8x16xf32, #tpu.memory_space<vmem>>, %arg12: memref<32x128xf32, #tpu.memory_space<vmem>>, %arg13: memref<32x128xf32, #tpu.memory_space<vmem>>, %arg14: memref<32x128xf32, #tpu.memory_space<vmem>>, %arg15: memref<32x128xf32, #tpu.memory_space<vmem>>, %arg16: memref<1x128xf32, #tpu.memory_space<vmem>>, %arg17: memref<1x128xf32, #tpu.memory_space<vmem>>, %arg18: memref<1x1xf32, #tpu.memory_space<vmem>>, %arg19: memref<8x128xf32, #tpu.memory_space<vmem>>) attributes {dimension_semantics = [#tpu.dimension_semantics<arbitrary>], iteration_bounds = array<i64: 1>, scalar_prefetch = 0 : i64, scratch_operands = 0 : i64, tpu.core_type = #tpu.core_type<tc>, window_params = [{pipeline_mode = #tpu.pipeline_mode<synchronous>, transform_indices = @transform_0, window_bounds = array<i64: 16, 4>}, {pipeline_mode = #tpu.pipeline_mode<synchronous>, transform_indices = @transform_1, window_bounds = array<i64: 2, 16, 16>}, {pipeline_mode = #tpu.pipeline_mode<synchronous>, transform_indices = @transform_2, window_bounds = array<i64: 2, 4, 32>}, {pipeline_mode = #tpu.pipeline_mode<synchronous>, transform_indices = @transform_3, window_bounds = array<i64: 4, 32>}, {pipeline_mode = #tpu.pipeline_mode<synchronous>, transform_indices = @transform_4, window_bounds = array<i64: 1, 32>}, {pipeline_mode = #tpu.pipeline_mode<synchronous>, transform_indices = @transform_5, window_bounds = array<i64: 2, 16, 16>}, {pipeline_mode = #tpu.pipeline_mode<synchronous>, transform_indices = @transform_6, window_bounds = array<i64: 2, 32, 32>}, {pipeline_mode = #tpu.pipeline_mode<synchronous>, transform_indices = @transform_7, window_bounds = array<i64: 32, 32>}, {pipeline_mode = #tpu.pipeline_mode<synchronous>, transform_indices = @transform_8, window_bounds = array<i64: 1, 32>}, {pipeline_mode = #tpu.pipeline_mode<synchronous>, transform_indices = @transform_9, window_bounds = array<i64: 8, 16>}, {pipeline_mode = #tpu.pipeline_mode<synchronous>, transform_indices = @transform_10, window_bounds = array<i64: 8, 16>}, {pipeline_mode = #tpu.pipeline_mode<synchronous>, transform_indices = @transform_11, window_bounds = array<i64: 32, 128>}, {pipeline_mode = #tpu.pipeline_mode<synchronous>, transform_indices = @transform_12, window_bounds = array<i64: 32, 128>}, {pipeline_mode = #tpu.pipeline_mode<synchronous>, transform_indices = @transform_13, window_bounds = array<i64: 32, 128>}, {pipeline_mode = #tpu.pipeline_mode<synchronous>, transform_indices = @transform_14, window_bounds = array<i64: 32, 128>}, {pipeline_mode = #tpu.pipeline_mode<synchronous>, transform_indices = @transform_15, window_bounds = array<i64: 1, 128>}, {pipeline_mode = #tpu.pipeline_mode<synchronous>, transform_indices = @transform_16, window_bounds = array<i64: 1, 128>}, {pipeline_mode = #tpu.pipeline_mode<synchronous>, transform_indices = @transform_17, window_bounds = array<i64: 1, 1>}, {pipeline_mode = #tpu.pipeline_mode<synchronous>, transform_indices = @transform_18, window_bounds = array<i64: 8, 128>}]} {
    %c0 = arith.constant 0 : index
    %c0_0 = arith.constant 0 : index
    %0 = vector.load %arg1[%c0, %c0_0] : memref<16x4xf32, #tpu.memory_space<vmem>>, vector<16x4xf32>
    %c0_1 = arith.constant 0 : index
    %c0_2 = arith.constant 0 : index
    %1 = vector.load %arg4[%c0_1, %c0_2] : memref<4x32xf32, #tpu.memory_space<vmem>>, vector<4x32xf32>
    %cst = arith.constant dense<0.000000e+00> : vector<16x32xf32>
    %2 = tpu.matmul %0, %1, %cst {dimension_numbers = #tpu.dot_dimension_numbers<[1], [0], [0], [1], [0, 0, 1, 1], [], []>} : vector<16x4xf32>, vector<4x32xf32>, vector<16x32xf32> -> vector<16x32xf32>
    %c0_3 = arith.constant 0 : index
    %c0_4 = arith.constant 0 : index
    %3 = vector.load %arg5[%c0_3, %c0_4] : memref<1x32xf32, #tpu.memory_space<vmem>>, vector<1x32xf32>
    %4 = vector.broadcast %3 : vector<1x32xf32> to vector<16x32xf32>
    %5 = arith.addf %2, %4 : vector<16x32xf32>
    %c0_5 = arith.constant 0 : index
    %c0_6 = arith.constant 0 : index
    %c0_7 = arith.constant 0 : index
    %6 = vector.load %arg2[%c0_5, %c0_6, %c0_7] : memref<2x16x16xf32, #tpu.memory_space<vmem>>, vector<1x16x16xf32>
    %7 = vector.shape_cast %6 : vector<1x16x16xf32> to vector<16x16xf32>
    %cst_8 = arith.constant dense<0.000000e+00> : vector<16x4xf32>
    %8 = tpu.matmul %7, %0, %cst_8 {dimension_numbers = #tpu.dot_dimension_numbers<[1], [0], [0], [1], [0, 0, 1, 1], [], []>} : vector<16x16xf32>, vector<16x4xf32>, vector<16x4xf32> -> vector<16x4xf32>
    %c0_9 = arith.constant 0 : index
    %c0_10 = arith.constant 0 : index
    %c0_11 = arith.constant 0 : index
    %9 = vector.load %arg3[%c0_9, %c0_10, %c0_11] : memref<2x4x32xf32, #tpu.memory_space<vmem>>, vector<1x4x32xf32>
    %10 = vector.shape_cast %9 : vector<1x4x32xf32> to vector<4x32xf32>
    %cst_12 = arith.constant dense<0.000000e+00> : vector<16x32xf32>
    %11 = tpu.matmul %8, %10, %cst_12 {dimension_numbers = #tpu.dot_dimension_numbers<[1], [0], [0], [1], [0, 0, 1, 1], [], []>} : vector<16x4xf32>, vector<4x32xf32>, vector<16x32xf32> -> vector<16x32xf32>
    %12 = arith.addf %5, %11 : vector<16x32xf32>
    %c1 = arith.constant 1 : index
    %c0_13 = arith.constant 0 : index
    %c0_14 = arith.constant 0 : index
    %13 = vector.load %arg2[%c1, %c0_13, %c0_14] : memref<2x16x16xf32, #tpu.memory_space<vmem>>, vector<1x16x16xf32>
    %14 = vector.shape_cast %13 : vector<1x16x16xf32> to vector<16x16xf32>
    %cst_15 = arith.constant dense<0.000000e+00> : vector<16x4xf32>
    %15 = tpu.matmul %14, %0, %cst_15 {dimension_numbers = #tpu.dot_dimension_numbers<[1], [0], [0], [1], [0, 0, 1, 1], [], []>} : vector<16x16xf32>, vector<16x4xf32>, vector<16x4xf32> -> vector<16x4xf32>
    %c1_16 = arith.constant 1 : index
    %c0_17 = arith.constant 0 : index
    %c0_18 = arith.constant 0 : index
    %16 = vector.load %arg3[%c1_16, %c0_17, %c0_18] : memref<2x4x32xf32, #tpu.memory_space<vmem>>, vector<1x4x32xf32>
    %17 = vector.shape_cast %16 : vector<1x4x32xf32> to vector<4x32xf32>
    %cst_19 = arith.constant dense<0.000000e+00> : vector<16x32xf32>
    %18 = tpu.matmul %15, %17, %cst_19 {dimension_numbers = #tpu.dot_dimension_numbers<[1], [0], [0], [1], [0, 0, 1, 1], [], []>} : vector<16x4xf32>, vector<4x32xf32>, vector<16x32xf32> -> vector<16x32xf32>
    %19 = arith.addf %12, %18 : vector<16x32xf32>
    %20 = math.tanh %19 : vector<16x32xf32>
    %c0_20 = arith.constant 0 : index
    %c0_21 = arith.constant 0 : index
    %21 = vector.load %arg12[%c0_20, %c0_21] : memref<32x128xf32, #tpu.memory_space<vmem>>, vector<32x128xf32>
    %cst_22 = arith.constant dense<0.000000e+00> : vector<16x128xf32>
    %22 = tpu.matmul %20, %21, %cst_22 {dimension_numbers = #tpu.dot_dimension_numbers<[1], [0], [0], [1], [0, 0, 1, 1], [], []>} : vector<16x32xf32>, vector<32x128xf32>, vector<16x128xf32> -> vector<16x128xf32>
    %c0_23 = arith.constant 0 : index
    %c0_24 = arith.constant 0 : index
    %23 = vector.load %arg14[%c0_23, %c0_24] : memref<32x128xf32, #tpu.memory_space<vmem>>, vector<32x128xf32>
    %cst_25 = arith.constant dense<0.000000e+00> : vector<16x128xf32>
    %24 = tpu.matmul %20, %23, %cst_25 {dimension_numbers = #tpu.dot_dimension_numbers<[1], [0], [0], [1], [0, 0, 1, 1], [], []>} : vector<16x32xf32>, vector<32x128xf32>, vector<16x128xf32> -> vector<16x128xf32>
    %c0_26 = arith.constant 0 : index
    %c0_27 = arith.constant 0 : index
    %25 = vector.load %arg8[%c0_26, %c0_27] : memref<32x32xf32, #tpu.memory_space<vmem>>, vector<32x32xf32>
    %cst_28 = arith.constant dense<0.000000e+00> : vector<16x32xf32>
    %26 = tpu.matmul %20, %25, %cst_28 {dimension_numbers = #tpu.dot_dimension_numbers<[1], [0], [0], [1], [0, 0, 1, 1], [], []>} : vector<16x32xf32>, vector<32x32xf32>, vector<16x32xf32> -> vector<16x32xf32>
    %c0_29 = arith.constant 0 : index
    %c0_30 = arith.constant 0 : index
    %27 = vector.load %arg9[%c0_29, %c0_30] : memref<1x32xf32, #tpu.memory_space<vmem>>, vector<1x32xf32>
    %28 = vector.broadcast %27 : vector<1x32xf32> to vector<16x32xf32>
    %29 = arith.addf %26, %28 : vector<16x32xf32>
    %c0_31 = arith.constant 0 : index
    %c0_32 = arith.constant 0 : index
    %c0_33 = arith.constant 0 : index
    %30 = vector.load %arg6[%c0_31, %c0_32, %c0_33] : memref<2x16x16xf32, #tpu.memory_space<vmem>>, vector<1x16x16xf32>
    %31 = vector.shape_cast %30 : vector<1x16x16xf32> to vector<16x16xf32>
    %cst_34 = arith.constant dense<0.000000e+00> : vector<16x32xf32>
    %32 = tpu.matmul %31, %20, %cst_34 {dimension_numbers = #tpu.dot_dimension_numbers<[1], [0], [0], [1], [0, 0, 1, 1], [], []>} : vector<16x16xf32>, vector<16x32xf32>, vector<16x32xf32> -> vector<16x32xf32>
    %c0_35 = arith.constant 0 : index
    %c0_36 = arith.constant 0 : index
    %c0_37 = arith.constant 0 : index
    %33 = vector.load %arg7[%c0_35, %c0_36, %c0_37] : memref<2x32x32xf32, #tpu.memory_space<vmem>>, vector<1x32x32xf32>
    %34 = vector.shape_cast %33 : vector<1x32x32xf32> to vector<32x32xf32>
    %cst_38 = arith.constant dense<0.000000e+00> : vector<16x32xf32>
    %35 = tpu.matmul %32, %34, %cst_38 {dimension_numbers = #tpu.dot_dimension_numbers<[1], [0], [0], [1], [0, 0, 1, 1], [], []>} : vector<16x32xf32>, vector<32x32xf32>, vector<16x32xf32> -> vector<16x32xf32>
    %36 = arith.addf %29, %35 : vector<16x32xf32>
    %c1_39 = arith.constant 1 : index
    %c0_40 = arith.constant 0 : index
    %c0_41 = arith.constant 0 : index
    %37 = vector.load %arg6[%c1_39, %c0_40, %c0_41] : memref<2x16x16xf32, #tpu.memory_space<vmem>>, vector<1x16x16xf32>
    %38 = vector.shape_cast %37 : vector<1x16x16xf32> to vector<16x16xf32>
    %cst_42 = arith.constant dense<0.000000e+00> : vector<16x32xf32>
    %39 = tpu.matmul %38, %20, %cst_42 {dimension_numbers = #tpu.dot_dimension_numbers<[1], [0], [0], [1], [0, 0, 1, 1], [], []>} : vector<16x16xf32>, vector<16x32xf32>, vector<16x32xf32> -> vector<16x32xf32>
    %c1_43 = arith.constant 1 : index
    %c0_44 = arith.constant 0 : index
    %c0_45 = arith.constant 0 : index
    %40 = vector.load %arg7[%c1_43, %c0_44, %c0_45] : memref<2x32x32xf32, #tpu.memory_space<vmem>>, vector<1x32x32xf32>
    %41 = vector.shape_cast %40 : vector<1x32x32xf32> to vector<32x32xf32>
    %cst_46 = arith.constant dense<0.000000e+00> : vector<16x32xf32>
    %42 = tpu.matmul %39, %41, %cst_46 {dimension_numbers = #tpu.dot_dimension_numbers<[1], [0], [0], [1], [0, 0, 1, 1], [], []>} : vector<16x32xf32>, vector<32x32xf32>, vector<16x32xf32> -> vector<16x32xf32>
    %43 = arith.addf %36, %42 : vector<16x32xf32>
    %44 = math.tanh %43 : vector<16x32xf32>
    %c0_47 = arith.constant 0 : index
    %c0_48 = arith.constant 0 : index
    %45 = vector.load %arg13[%c0_47, %c0_48] : memref<32x128xf32, #tpu.memory_space<vmem>>, vector<32x128xf32>
    %cst_49 = arith.constant dense<0.000000e+00> : vector<16x128xf32>
    %46 = tpu.matmul %44, %45, %cst_49 {dimension_numbers = #tpu.dot_dimension_numbers<[1], [0], [0], [1], [0, 0, 1, 1], [], []>} : vector<16x32xf32>, vector<32x128xf32>, vector<16x128xf32> -> vector<16x128xf32>
    %c0_50 = arith.constant 0 : index
    %c0_51 = arith.constant 0 : index
    %47 = vector.load %arg15[%c0_50, %c0_51] : memref<32x128xf32, #tpu.memory_space<vmem>>, vector<32x128xf32>
    %cst_52 = arith.constant dense<0.000000e+00> : vector<16x128xf32>
    %48 = tpu.matmul %44, %47, %cst_52 {dimension_numbers = #tpu.dot_dimension_numbers<[1], [0], [0], [1], [0, 0, 1, 1], [], []>} : vector<16x32xf32>, vector<32x128xf32>, vector<16x128xf32> -> vector<16x128xf32>
    %49 = arith.addf %22, %46 : vector<16x128xf32>
    %50 = arith.addf %24, %48 : vector<16x128xf32>
    %c0_53 = arith.constant 0 : index
    %c0_54 = arith.constant 0 : index
    %51 = vector.load %arg10[%c0_53, %c0_54] : memref<8x16xf32, #tpu.memory_space<vmem>>, vector<8x16xf32>
    %cst_55 = arith.constant dense<0.000000e+00> : vector<8x128xf32>
    %52 = tpu.matmul %51, %49, %cst_55 {dimension_numbers = #tpu.dot_dimension_numbers<[1], [0], [0], [1], [0, 0, 1, 1], [], []>} : vector<8x16xf32>, vector<16x128xf32>, vector<8x128xf32> -> vector<8x128xf32>
    %c0_56 = arith.constant 0 : index
    %c0_57 = arith.constant 0 : index
    %53 = vector.load %arg11[%c0_56, %c0_57] : memref<8x16xf32, #tpu.memory_space<vmem>>, vector<8x16xf32>
    %cst_58 = arith.constant dense<0.000000e+00> : vector<8x128xf32>
    %54 = tpu.matmul %53, %50, %cst_58 {dimension_numbers = #tpu.dot_dimension_numbers<[1], [0], [0], [1], [0, 0, 1, 1], [], []>} : vector<8x16xf32>, vector<16x128xf32>, vector<8x128xf32> -> vector<8x128xf32>
    %55 = arith.addf %52, %54 : vector<8x128xf32>
    %c0_59 = arith.constant 0 : index
    %c0_60 = arith.constant 0 : index
    %56 = vector.load %arg16[%c0_59, %c0_60] : memref<1x128xf32, #tpu.memory_space<vmem>>, vector<1x128xf32>
    %57 = vector.broadcast %56 : vector<1x128xf32> to vector<8x128xf32>
    %58 = arith.addf %55, %57 : vector<8x128xf32>
    %cst_61 = arith.constant 0.000000e+00 : f32
    %59 = vector.broadcast %cst_61 : f32 to vector<8x128xf32>
    %60 = arith.maximumf %58, %59 : vector<8x128xf32>
    %c0_62 = arith.constant 0 : index
    %c0_63 = arith.constant 0 : index
    %61 = vector.load %arg17[%c0_62, %c0_63] : memref<1x128xf32, #tpu.memory_space<vmem>>, vector<1x128xf32>
    %62 = vector.broadcast %61 : vector<1x128xf32> to vector<8x128xf32>
    %63 = arith.mulf %60, %62 : vector<8x128xf32>
    %cst_64 = arith.constant dense<0.000000e+00> : vector<8xf32>
    %64 = vector.multi_reduction <add>, %63, %cst_64 [1] : vector<8x128xf32> to vector<8xf32>
    %65 = vector.shape_cast %64 : vector<8xf32> to vector<8x1xf32>
    %c0_65 = arith.constant 0 : index
    %c0_66 = arith.constant 0 : index
    %66 = vector.load %arg18[%c0_65, %c0_66] : memref<1x1xf32, #tpu.memory_space<vmem>>, vector<1x1xf32>
    %67 = vector.broadcast %66 : vector<1x1xf32> to vector<8x1xf32>
    %68 = arith.addf %65, %67 : vector<8x1xf32>
    %69 = vector.shape_cast %68 : vector<8x1xf32> to vector<8x1xf32>
    %70 = vector.broadcast %69 : vector<8x1xf32> to vector<8x128xf32>
    %c0_67 = arith.constant 0 : index
    %c0_68 = arith.constant 0 : index
    %71 = vector.load %arg19[%c0_67, %c0_68] : memref<8x128xf32, #tpu.memory_space<vmem>>, vector<8x128xf32>
    tpu.vector_store %arg19[%c0_67, %c0_68], %70 {strides = array<i32>} : memref<8x128xf32, #tpu.memory_space<vmem>>, vector<8x128xf32>,
    return
  }
  func.func @transform_0(%arg0: i32) -> (i32, i32) {
    %c0_i32 = arith.constant 0 : i32
    %c0_i32_0 = arith.constant 0 : i32
    %c0_i32_1 = arith.constant 0 : i32
    return %c0_i32, %c0_i32_0 : i32, i32
  }
  func.func @transform_1(%arg0: i32) -> (i32, i32, i32) {
    %c0_i32 = arith.constant 0 : i32
    %c0_i32_0 = arith.constant 0 : i32
    %c0_i32_1 = arith.constant 0 : i32
    %c0_i32_2 = arith.constant 0 : i32
    return %c0_i32, %c0_i32_0, %c0_i32_1 : i32, i32, i32
  }
  func.func @transform_2(%arg0: i32) -> (i32, i32, i32) {
    %c0_i32 = arith.constant 0 : i32
    %c0_i32_0 = arith.constant 0 : i32
    %c0_i32_1 = arith.constant 0 : i32
    %c0_i32_2 = arith.constant 0 : i32
    return %c0_i32, %c0_i32_0, %c0_i32_1 : i32, i32, i32
  }
  func.func @transform_3(%arg0: i32) -> (i32, i32) {
    %c0_i32 = arith.constant 0 : i32
    %c0_i32_0 = arith.constant 0 : i32
    %c0_i32_1 = arith.constant 0 : i32
    return %c0_i32, %c0_i32_0 : i32, i32
  }
  func.func @transform_4(%arg0: i32) -> (i32, i32) {
    %c0_i32 = arith.constant 0 : i32
    %c0_i32_0 = arith.constant 0 : i32
    %c0_i32_1 = arith.constant 0 : i32
    return %c0_i32, %c0_i32_0 : i32, i32
  }
  func.func @transform_5(%arg0: i32) -> (i32, i32, i32) {
    %c0_i32 = arith.constant 0 : i32
    %c0_i32_0 = arith.constant 0 : i32
    %c0_i32_1 = arith.constant 0 : i32
    %c0_i32_2 = arith.constant 0 : i32
    return %c0_i32, %c0_i32_0, %c0_i32_1 : i32, i32, i32
  }
  func.func @transform_6(%arg0: i32) -> (i32, i32, i32) {
    %c0_i32 = arith.constant 0 : i32
    %c0_i32_0 = arith.constant 0 : i32
    %c0_i32_1 = arith.constant 0 : i32
    %c0_i32_2 = arith.constant 0 : i32
    return %c0_i32, %c0_i32_0, %c0_i32_1 : i32, i32, i32
  }
  func.func @transform_7(%arg0: i32) -> (i32, i32) {
    %c0_i32 = arith.constant 0 : i32
    %c0_i32_0 = arith.constant 0 : i32
    %c0_i32_1 = arith.constant 0 : i32
    return %c0_i32, %c0_i32_0 : i32, i32
  }
  func.func @transform_8(%arg0: i32) -> (i32, i32) {
    %c0_i32 = arith.constant 0 : i32
    %c0_i32_0 = arith.constant 0 : i32
    %c0_i32_1 = arith.constant 0 : i32
    return %c0_i32, %c0_i32_0 : i32, i32
  }
  func.func @transform_9(%arg0: i32) -> (i32, i32) {
    %c0_i32 = arith.constant 0 : i32
    %c0_i32_0 = arith.constant 0 : i32
    %c0_i32_1 = arith.constant 0 : i32
    return %c0_i32, %c0_i32_0 : i32, i32
  }
  func.func @transform_10(%arg0: i32) -> (i32, i32) {
    %c0_i32 = arith.constant 0 : i32
    %c0_i32_0 = arith.constant 0 : i32
    %c0_i32_1 = arith.constant 0 : i32
    return %c0_i32, %c0_i32_0 : i32, i32
  }
  func.func @transform_11(%arg0: i32) -> (i32, i32) {
    %c0_i32 = arith.constant 0 : i32
    %c0_i32_0 = arith.constant 0 : i32
    %c0_i32_1 = arith.constant 0 : i32
    return %c0_i32, %c0_i32_0 : i32, i32
  }
  func.func @transform_12(%arg0: i32) -> (i32, i32) {
    %c0_i32 = arith.constant 0 : i32
    %c0_i32_0 = arith.constant 0 : i32
    %c0_i32_1 = arith.constant 0 : i32
    return %c0_i32, %c0_i32_0 : i32, i32
  }
  func.func @transform_13(%arg0: i32) -> (i32, i32) {
    %c0_i32 = arith.constant 0 : i32
    %c0_i32_0 = arith.constant 0 : i32
    %c0_i32_1 = arith.constant 0 : i32
    return %c0_i32, %c0_i32_0 : i32, i32
  }
  func.func @transform_14(%arg0: i32) -> (i32, i32) {
    %c0_i32 = arith.constant 0 : i32
    %c0_i32_0 = arith.constant 0 : i32
    %c0_i32_1 = arith.constant 0 : i32
    return %c0_i32, %c0_i32_0 : i32, i32
  }
  func.func @transform_15(%arg0: i32) -> (i32, i32) {
    %c0_i32 = arith.constant 0 : i32
    %c0_i32_0 = arith.constant 0 : i32
    %c0_i32_1 = arith.constant 0 : i32
    return %c0_i32, %c0_i32_0 : i32, i32
  }
  func.func @transform_16(%arg0: i32) -> (i32, i32) {
    %c0_i32 = arith.constant 0 : i32
    %c0_i32_0 = arith.constant 0 : i32
    %c0_i32_1 = arith.constant 0 : i32
    return %c0_i32, %c0_i32_0 : i32, i32
  }
  func.func @transform_17(%arg0: i32) -> (i32, i32) {
    %c0_i32 = arith.constant 0 : i32
    %c0_i32_0 = arith.constant 0 : i32
    %c0_i32_1 = arith.constant 0 : i32
    return %c0_i32, %c0_i32_0 : i32, i32
  }
  func.func @transform_18(%arg0: i32) -> (i32, i32) {
    %c0_i32 = arith.constant 0 : i32
    %c0_i32_0 = arith.constant 0 : i32
    %c0_i32_1 = arith.constant 0 : i32
    return %c0_i32, %c0_i32_0 : i32, i32
  }
}

</mosaic_0001>

<bundles_post_ra>
// kernel: tpu_custom_call.1
= control target key start
LH: loop header
LB: loop body
LE: loop exit
PB: predicated region body
PF: predicated region fallthrough
CT: control target
= control target key end

     0   :  { %s2619_s0 = inlined_call_operand.vmem [shape: f32[16,4], index: 0, kind: input, shape index: {}]   ;;  %s2620_s1 = inlined_call_operand.hbm [shape: f32[2,16,16], index: 1, kind: input, shape index: {}]   ;;  %s2621_s2 = inlined_call_operand.hbm [shape: f32[2,4,32], index: 2, kind: input, shape index: {}]   ;;  %s2622_s3 = inlined_call_operand.hbm [shape: f32[4,32], index: 3, kind: input, shape index: {}]   ;;  %s2623_s4 = inlined_call_operand.vmem [shape: f32[1,32], index: 4, kind: input, shape index: {}]   ;;  %s2624_s5 = inlined_call_operand.vmem [shape: f32[2,16,16], index: 5, kind: input, shape index: {}]   ;;  %s2625_s6 = inlined_call_operand.hbm [shape: f32[2,32,32], index: 6, kind: input, shape index: {}]   ;;  %s2626_s7 = inlined_call_operand.hbm [shape: f32[32,32], index: 7, kind: input, shape index: {}]   ;;  %s2627_s8 = inlined_call_operand.hbm [shape: f32[1,32], index: 8, kind: input, shape index: {}]   ;;  %s2628_s9 = inlined_call_operand.hbm [shape: f32[8,16], index: 9, kind: input, shape index: {}]   ;;  %s2629_s10 = inlined_call_operand.hbm [shape: f32[8,16], index: 10, kind: input, shape index: {}]   ;;  %s2630_s11 = inlined_call_operand.vmem [shape: f32[32,128], index: 11, kind: input, shape index: {}]   ;;  %s2631_s12 = inlined_call_operand.hbm [shape: f32[32,128], index: 12, kind: input, shape index: {}]   ;;  %s2632_s13 = inlined_call_operand.hbm [shape: f32[32,128], index: 13, kind: input, shape index: {}]   ;;  %s2633_s14 = inlined_call_operand.hbm [shape: f32[32,128], index: 14, kind: input, shape index: {}]   ;;  %s2634_s15 = inlined_call_operand.vmem [shape: f32[1,128], index: 15, kind: input, shape index: {}]   ;;  %s2635_s16 = inlined_call_operand.vmem [shape: f32[1,128], index: 16, kind: input, shape index: {}]   ;;  %s2636_s17 = inlined_call_operand.<no memory space> [shape: f32[1,1], index: 17, kind: input, shape index: {}]   ;;  %s2637_s18 = inlined_call_operand.hbm [shape: f32[8,128], index: 18, kind: output, shape index: {}]  }
   0x1   :  { %2642 = sst [smem:[#allocation29_spill]] %s2619_s0  ;;  %v23_v0 = vstv %s2636_s17 }
   0x2   :  { %2643 = sst [smem:[#allocation30_spill]] %s2620_s1  ;;  %24 = vst [vmem:[#allocation2] sm:$0x1] %v23_v0 }
   0x3   :  { %2644 = sst [smem:[#allocation31_spill]] %s2621_s2 }
   0x4   :  { %2645 = sst [smem:[#allocation32_spill]] %s2637_s18 }
   0x5   :  { %25 = vsyncpa [#allocation4], 0 }
   0x6   :  { %26 = vsyncpa [#allocation7], 0 }
   0x7   :  { %27 = vsyncpa [#allocation10], 0 }
   0x8   :  { %28 = vsyncpa [#allocation13], 0 }
   0x9   :  { %29 = vsyncpa [#allocation16], 0 }
   0xa   :  { %30 = vsyncpa [#allocation19], 0 }
   0xb   :  { %31 = vsyncpa [#allocation5], 0  ;;  %s2252_s29 = smov [#allocation6]   ;;  %s2646_s1 = sld [smem:[#allocation31_spill]] }
   0xc   :  { %s51_s30 = sshll.u32 %s2252_s29, 4  ;;  %s52_s30 = int_to_ptr.vmem [resolvable:$true] %s51_s30 }
  0x11   :  { %s1974_s20 = scalar_lea.hbm %s2646_s1, 128 }
  0x12   :  { %p1975_p0 = scmp.ne.s32.totalorder %s2646_s1, %s1974_s20  ;;  %p1978_p1 = scmp.lt.u32.totalorder %s1974_s20, %s2646_s1 }
  0x14   :  { %p1980_p2 = pnand %p1978_p1, %p1975_p0 }
  0x16   :  { %1983 = shalt.err (!%p1980_p2)
}
  0x17   :  { %s1984_s23 = scalar_lea.vmem %s52_s30, 128  ;;  %p1989_p4 = scmp.lt.s32.totalorder %s52_s30, %s52_s30 }
  0x18   :  { %p1985_p3 = scmp.ne.s32.totalorder %s52_s30, %s1984_s23  ;;  %p1990_p5 = scmp.lt.s32.totalorder %s1984_s23, %s1984_s23 }
  0x1a   :  { %p1991_p6 = por %p1990_p5, %p1989_p4 }
  0x1c   :  { %p1992_p7 = pnand %p1991_p6, %p1985_p3 }
  0x1e   :  { %1995 = shalt.err (!%p1992_p7)
}
  0x1f   :  { %s2253_s24 = smov 64   ;;  %s2254_s25 = smov 4  }
  0x20   :  { %57 = dma.hbm_to_vmem [thread:$0]  %s2646_s1, 128, %s52_s30, [#allocation7], %s2253_s24, %s2253_s24, %s2254_s25  }
  0x21   :  { %s2255_s28 = smov [#allocation9]   ;;  %s2256_s0 = smov [#allocation12]  }
  0x22   :  { %s77_s29 = sshll.u32 %s2255_s28, 4  ;;  %s102_s19 = sshll.u32 %s2256_s0, 4  ;;  %s78_s29 = int_to_ptr.vmem [resolvable:$true] %s77_s29  ;;  %s103_s19 = int_to_ptr.vmem [resolvable:$true] %s102_s19 }
  0x23   :  { %s1996_s22 = scalar_lea.hbm %s2625_s6, 1024 }
  0x24   :  { %p1997_p8 = scmp.ne.s32.totalorder %s2625_s6, %s1996_s22  ;;  %p2000_p9 = scmp.lt.u32.totalorder %s1996_s22, %s2625_s6 }
  0x26   :  { %p2002_p10 = pnand %p2000_p9, %p1997_p8 }
  0x28   :  { %2005 = shalt.err (!%p2002_p10)
}
  0x29   :  { %s2006_s30 = scalar_lea.vmem %s78_s29, 1024  ;;  %p2011_p12 = scmp.lt.s32.totalorder %s78_s29, %s78_s29 }
  0x2a   :  { %p2007_p11 = scmp.ne.s32.totalorder %s78_s29, %s2006_s30  ;;  %p2012_p13 = scmp.lt.s32.totalorder %s2006_s30, %s2006_s30 }
  0x2c   :  { %p2013_p0 = por %p2012_p13, %p2011_p12 }
  0x2e   :  { %p2014_p1 = pnand %p2013_p0, %p2007_p11 }
  0x30   :  { %2017 = shalt.err (!%p2014_p1)
}
  0x31   :  { %s2257_s1 = smov 128   ;;  %s2258_s24 = smov 8  }
  0x32   :  { %83 = dma.hbm_to_vmem [thread:$0]  %s2625_s6, 1024, %s78_s29, [#allocation10], %s2257_s1, %s2257_s1, %s2258_s24  }
  0x33   :  { %s2018_s28 = scalar_lea.hbm %s2627_s8, 16 }
  0x34   :  { %p2019_p2 = scmp.ne.s32.totalorder %s2627_s8, %s2018_s28  ;;  %p2022_p3 = scmp.lt.u32.totalorder %s2018_s28, %s2627_s8 }
  0x36   :  { %p2024_p4 = pnand %p2022_p3, %p2019_p2 }
  0x38   :  { %2027 = shalt.err (!%p2024_p4)
}
  0x39   :  { %s2028_s17 = scalar_lea.vmem %s103_s19, 16  ;;  %s2032_s2 = scalar_lea.vmem %s103_s19, 32 }
  0x3a   :  { %p2029_p5 = scmp.ne.s32.totalorder %s103_s19, %s2028_s17  ;;  %p2033_p6 = scmp.lt.s32.totalorder %s103_s19, %s103_s19 }
  0x3b   :  { %p2034_p7 = scmp.lt.s32.totalorder %s2032_s2, %s2028_s17 }
  0x3d   :  { %p2035_p8 = por %p2034_p7, %p2033_p6 }
  0x3f   :  { %p2036_p9 = pnand %p2035_p8, %p2029_p5 }
  0x41   :  { %2039 = shalt.err (!%p2036_p9)
}
  0x42   :  { %105 = dma.hbm_to_vmem [thread:$0]  %s2627_s8, 16, %s103_s19, [#allocation13]  }
  0x43   :  { %s2259_s23 = smov [#allocation15]   ;;  %s2260_s25 = smov [#allocation18]  }
  0x44   :  { %s122_s30 = sshll.u32 %s2259_s23, 4  ;;  %s145_s26 = sshll.u32 %s2260_s25, 4  ;;  %s123_s30 = int_to_ptr.vmem [resolvable:$true] %s122_s30  ;;  %s146_s26 = int_to_ptr.vmem [resolvable:$true] %s145_s26 }
  0x45   :  { %s2040_s28 = scalar_lea.hbm %s2629_s10, 128 }
  0x46   :  { %p2041_p10 = scmp.ne.s32.totalorder %s2629_s10, %s2040_s28  ;;  %p2044_p11 = scmp.lt.u32.totalorder %s2040_s28, %s2629_s10 }
  0x48   :  { %p2046_p12 = pnand %p2044_p11, %p2041_p10 }
  0x4a   :  { %2049 = shalt.err (!%p2046_p12)
}
  0x4b   :  { %s2050_s8 = scalar_lea.vmem %s123_s30, 128  ;;  %p2055_p0 = scmp.lt.s32.totalorder %s123_s30, %s123_s30 }
  0x4c   :  { %p2051_p13 = scmp.ne.s32.totalorder %s123_s30, %s2050_s8  ;;  %p2056_p1 = scmp.lt.s32.totalorder %s2050_s8, %s2050_s8 }
  0x4e   :  { %p2057_p2 = por %p2056_p1, %p2055_p0 }
  0x50   :  { %p2058_p3 = pnand %p2057_p2, %p2051_p13 }
  0x52   :  { %2061 = shalt.err (!%p2058_p3)
}
  0x53   :  { %125 = dma.hbm_to_vmem [thread:$0]  %s2629_s10, 128, %s123_s30, [#allocation16]  }
  0x54   :  { %s2062_s29 = scalar_lea.hbm %s2632_s13, 512 }
  0x55   :  { %p2063_p4 = scmp.ne.s32.totalorder %s2632_s13, %s2062_s29  ;;  %p2066_p5 = scmp.lt.u32.totalorder %s2062_s29, %s2632_s13 }
  0x57   :  { %p2068_p6 = pnand %p2066_p5, %p2063_p4 }
  0x59   :  { %2071 = shalt.err (!%p2068_p6)
}
  0x5a   :  { %s2072_s28 = scalar_lea.vmem %s146_s26, 512  ;;  %p2077_p8 = scmp.lt.s32.totalorder %s146_s26, %s146_s26 }
  0x5b   :  { %p2073_p7 = scmp.ne.s32.totalorder %s146_s26, %s2072_s28  ;;  %p2078_p9 = scmp.lt.s32.totalorder %s2072_s28, %s2072_s28 }
  0x5d   :  { %p2079_p10 = por %p2078_p9, %p2077_p8 }
  0x5f   :  { %p2080_p11 = pnand %p2079_p10, %p2073_p7 }
  0x61   :  { %2083 = shalt.err (!%p2080_p11)
}
  0x62   :  { %151 = dma.hbm_to_vmem [thread:$0]  %s2632_s13, 512, %s146_s26, [#allocation19], %s2257_s1, %s2257_s1, %s2258_s24  }
  0x63   :  { %s2261_s0 = smov [#allocation3]   ;;  %s2262_s21 = smov [#allocation8]  }
  0x64   :  { %s39_s20 = sshll.u32 %s2261_s0, 4  ;;  %s64_s22 = sshll.u32 %s2262_s21, 4  ;;  %s40_s20 = int_to_ptr.vmem [resolvable:$true] %s39_s20  ;;  %s65_s22 = int_to_ptr.vmem [resolvable:$true] %s64_s22 }
  0x65   :  { %s2647_s17 = sld [smem:[#allocation30_spill]] }
  0x6b   :  { %s2084_s2 = scalar_lea.hbm %s2647_s17, 512 }
  0x6c   :  { %p2085_p12 = scmp.ne.s32.totalorder %s2647_s17, %s2084_s2  ;;  %p2088_p13 = scmp.lt.u32.totalorder %s2084_s2, %s2647_s17 }
  0x6e   :  { %p2090_p0 = pnand %p2088_p13, %p2085_p12 }
  0x70   :  { %2093 = shalt.err (!%p2090_p0)
}
  0x71   :  { %s2094_s13 = scalar_lea.vmem %s40_s20, 512  ;;  %p2099_p2 = scmp.lt.s32.totalorder %s40_s20, %s40_s20 }
  0x72   :  { %p2095_p1 = scmp.ne.s32.totalorder %s40_s20, %s2094_s13  ;;  %p2100_p3 = scmp.lt.s32.totalorder %s2094_s13, %s2094_s13 }
  0x74   :  { %p2101_p4 = por %p2100_p3, %p2099_p2 }
  0x76   :  { %p2102_p5 = pnand %p2101_p4, %p2095_p1 }
  0x78   :  { %2105 = shalt.err (!%p2102_p5)
}
  0x79   :  { %45 = dma.hbm_to_vmem [thread:$0]  %s2647_s17, 512, %s40_s20, [#allocation4], %s2257_s1, %s2257_s1, %s2258_s24  }
  0x7a   :  { %s2106_s10 = scalar_lea.hbm %s2622_s3, 64 }
  0x7b   :  { %p2107_p6 = scmp.ne.s32.totalorder %s2622_s3, %s2106_s10  ;;  %p2110_p7 = scmp.lt.u32.totalorder %s2106_s10, %s2622_s3 }
  0x7d   :  { %p2112_p8 = pnand %p2110_p7, %p2107_p6 }
  0x7f   :  { %2115 = shalt.err (!%p2112_p8)
}
  0x80   :  { %s2116_s19 = scalar_lea.vmem %s65_s22, 64  ;;  %p2121_p10 = scmp.lt.s32.totalorder %s65_s22, %s65_s22 }
  0x81   :  { %p2117_p9 = scmp.ne.s32.totalorder %s65_s22, %s2116_s19  ;;  %p2122_p11 = scmp.lt.s32.totalorder %s2116_s19, %s2116_s19 }
  0x83   :  { %p2123_p12 = por %p2122_p11, %p2121_p10 }
  0x85   :  { %p2124_p13 = pnand %p2123_p12, %p2117_p9 }
  0x87   :  { %2127 = shalt.err (!%p2124_p13)
}
  0x88   :  { %67 = dma.hbm_to_vmem [thread:$0]  %s2622_s3, 64, %s65_s22, [#allocation7]  }
  0x89   :  { %s2263_s2 = smov [#allocation11]   ;;  %s2264_s29 = smov [#allocation14]  }
  0x8a   :  { %s89_s6 = sshll.u32 %s2263_s2, 4  ;;  %s112_s23 = sshll.u32 %s2264_s29, 4  ;;  %s90_s6 = int_to_ptr.vmem [resolvable:$true] %s89_s6  ;;  %s113_s23 = int_to_ptr.vmem [resolvable:$true] %s112_s23 }
  0x8b   :  { %s2128_s26 = scalar_lea.hbm %s2626_s7, 512 }
  0x8c   :  { %p2129_p0 = scmp.ne.s32.totalorder %s2626_s7, %s2128_s26  ;;  %p2132_p1 = scmp.lt.u32.totalorder %s2128_s26, %s2626_s7 }
  0x8e   :  { %p2134_p2 = pnand %p2132_p1, %p2129_p0 }
  0x90   :  { %2137 = shalt.err (!%p2134_p2)
}
  0x91   :  { %s2138_s3 = scalar_lea.vmem %s90_s6, 512  ;;  %p2143_p4 = scmp.lt.s32.totalorder %s90_s6, %s90_s6 }
  0x92   :  { %p2139_p3 = scmp.ne.s32.totalorder %s90_s6, %s2138_s3  ;;  %p2144_p5 = scmp.lt.s32.totalorder %s2138_s3, %s2138_s3 }
  0x94   :  { %p2145_p6 = por %p2144_p5, %p2143_p4 }
  0x96   :  { %p2146_p7 = pnand %p2145_p6, %p2139_p3 }
  0x98   :  { %2149 = shalt.err (!%p2146_p7)
}
  0x99   :  { %95 = dma.hbm_to_vmem [thread:$0]  %s2626_s7, 512, %s90_s6, [#allocation10], %s2257_s1, %s2257_s1, %s2258_s24  }
  0x9a   :  { %s2150_s8 = scalar_lea.hbm %s2628_s9, 128 }
  0x9b   :  { %p2151_p8 = scmp.ne.s32.totalorder %s2628_s9, %s2150_s8  ;;  %p2154_p9 = scmp.lt.u32.totalorder %s2150_s8, %s2628_s9 }
  0x9d   :  { %p2156_p10 = pnand %p2154_p9, %p2151_p8 }
  0x9f   :  { %2159 = shalt.err (!%p2156_p10)
}
  0xa0   :  { %s2160_s29 = scalar_lea.vmem %s113_s23, 128  ;;  %p2165_p12 = scmp.lt.s32.totalorder %s113_s23, %s113_s23 }
  0xa1   :  { %p2161_p11 = scmp.ne.s32.totalorder %s113_s23, %s2160_s29  ;;  %p2166_p13 = scmp.lt.s32.totalorder %s2160_s29, %s2160_s29 }
  0xa3   :  { %p2167_p0 = por %p2166_p13, %p2165_p12 }
  0xa5   :  { %p2168_p1 = pnand %p2167_p0, %p2161_p11 }
  0xa7   :  { %2171 = shalt.err (!%p2168_p1)
}
  0xa8   :  { %115 = dma.hbm_to_vmem [thread:$0]  %s2628_s9, 128, %s113_s23, [#allocation13]  }
  0xa9   :  { %s2265_s25 = smov [#allocation17]   ;;  %s2266_s26 = smov [#allocation20]  }
  0xaa   :  { %s133_s13 = sshll.u32 %s2265_s25, 4  ;;  %s157_s18 = sshll.u32 %s2266_s26, 4  ;;  %s134_s13 = int_to_ptr.vmem [resolvable:$true] %s133_s13  ;;  %s158_s18 = int_to_ptr.vmem [resolvable:$true] %s157_s18 }
  0xab   :  { %s2172_s10 = scalar_lea.hbm %s2631_s12, 512 }
  0xac   :  { %p2173_p2 = scmp.ne.s32.totalorder %s2631_s12, %s2172_s10  ;;  %p2176_p3 = scmp.lt.u32.totalorder %s2172_s10, %s2631_s12 }
  0xae   :  { %p2178_p4 = pnand %p2176_p3, %p2173_p2 }
  0xb0   :  { %2181 = shalt.err (!%p2178_p4)
}
  0xb1   :  { %s2182_s9 = scalar_lea.vmem %s134_s13, 512  ;;  %p2187_p6 = scmp.lt.s32.totalorder %s134_s13, %s134_s13 }
  0xb2   :  { %p2183_p5 = scmp.ne.s32.totalorder %s134_s13, %s2182_s9  ;;  %p2188_p7 = scmp.lt.s32.totalorder %s2182_s9, %s2182_s9 }
  0xb4   :  { %p2189_p8 = por %p2188_p7, %p2187_p6 }
  0xb6   :  { %p2190_p9 = pnand %p2189_p8, %p2183_p5 }
  0xb8   :  { %2193 = shalt.err (!%p2190_p9)
}
  0xb9   :  { %139 = dma.hbm_to_vmem [thread:$0]  %s2631_s12, 512, %s134_s13, [#allocation16], %s2257_s1, %s2257_s1, %s2258_s24  }
  0xba   :  { %s2194_s20 = scalar_lea.hbm %s2633_s14, 512 }
  0xbb   :  { %p2195_p10 = scmp.ne.s32.totalorder %s2633_s14, %s2194_s20  ;;  %p2198_p11 = scmp.lt.u32.totalorder %s2194_s20, %s2633_s14 }
  0xbd   :  { %p2200_p12 = pnand %p2198_p11, %p2195_p10 }
  0xbf   :  { %2203 = shalt.err (!%p2200_p12)
}
  0xc0   :  { %s2204_s6 = scalar_lea.vmem %s158_s18, 512  ;;  %p2209_p0 = scmp.lt.s32.totalorder %s158_s18, %s158_s18 }
  0xc1   :  { %p2205_p13 = scmp.ne.s32.totalorder %s158_s18, %s2204_s6  ;;  %p2210_p1 = scmp.lt.s32.totalorder %s2204_s6, %s2204_s6 }
  0xc3   :  { %p2211_p2 = por %p2210_p1, %p2209_p0 }
  0xc5   :  { %p2212_p3 = pnand %p2211_p2, %p2205_p13 }
  0xc7   :  { %2215 = shalt.err (!%p2212_p3)
}
  0xc8   :  { %163 = dma.hbm_to_vmem [thread:$0]  %s2633_s14, 512, %s158_s18, [#allocation19], %s2257_s1, %s2257_s1, %s2258_s24  }
  0xc9   :  { %2238 = dma.done.wait [#allocation4], 512  }
  0xca   :  { %2239 = vsyncadd [#allocation4], 4294966784 }
  0xcb   :  { %2240 = dma.done.wait [#allocation7], 192  }
  0xcc   :  { %2241 = vsyncadd [#allocation7], 4294967104 }
  0xcd   :  { %2242 = dma.done.wait [#allocation10], 1536  }
  0xce   :  { %2243 = vsyncadd [#allocation10], 4294965760 }
  0xcf   :  { %2244 = dma.done.wait [#allocation13], 144  }
  0xd0   :  { %2245 = vsyncadd [#allocation13], 4294967152 }
  0xd1   :  { %2246 = dma.done.wait [#allocation16], 640  }
  0xd2   :  { %2247 = vsyncadd [#allocation16], 4294966656 }
  0xd3   :  { %2248 = dma.done.wait [#allocation19], 1024  }
  0xd4   :  { %2249 = vsyncadd [#allocation19], 4294966272  ;;  %vm220_vm0 = vcmask 1043456   ;;  %vm213_vm1 = vcmask 31744   ;;  %v205_v1 = vld [vmem:[#allocation8] sm:$0xf] }
  0xd5   :  { %s2648_s27 = sld [smem:[#allocation29_spill]]  ;;  %1717 = vmatprep.subr.msk.mxu1 %vm220_vm0, %v205_v1  ;;  %v299_v5 = vld [vmem:[#allocation3] sm:$0xff]  ;;  %vm301_vm2 = vcmask 130048   ;;  %v300_v6 = vld [vmem:[#allocation3 + $0x8] sm:$0xff]  ;;  %v471_v7 = vld [vmem:[#allocation3 + $0x10] sm:$0xff]  ;;  %vm663_vm3 = vcmask 261120  }
  0xd6   :  { %1718 = vmatpush3.msk.msra.mxu1 %vm220_vm0, %v205_v1  ;;  %v472_v8 = vld [vmem:[#allocation3 + $0x18] sm:$0xff]  ;;  %v383_v9 = vld [vmem:[#allocation6] sm:$0xf]  ;;  %v555_v10 = vld [vmem:[#allocation6 + $0x4] sm:$0xf]  ;;  %vm2268_vm4 = vmmov 0  }
  0xd7   :  { %1729 = vmatprep.subr.msk.mxu0 %vm220_vm0, %v383_v9  ;;  %v652_v17 = vld [vmem:[#allocation11] sm:$0xff]  ;;  %v653_v18 = vld [vmem:[#allocation11 + $0x8] sm:$0xff]  ;;  %v654_v19 = vld [vmem:[#allocation11 + $0x10] sm:$0xff]  ;;  %s2271_s12 = smov [#allocation21]  }
  0xd8   :  { %1730 = vmatpush3.msk.msra.mxu0 %vm220_vm0, %v383_v9  ;;  %v1859_v20 = vpack.c.bf16 %v653_v18, %v652_v17  ;;  %v655_v21 = vld [vmem:[#allocation11 + $0x18] sm:$0xff]  ;;  %v828_v24 = vld [vmem:[#allocation9] sm:$0xff]  ;;  %v829_v25 = vld [vmem:[#allocation9 + $0x8] sm:$0xff]  ;;  %s1590_s25 = sshll.u32 %s2271_s12, 4  ;;  %s1591_s25 = int_to_ptr.vmem [resolvable:$true] %s1590_s25 }
  0xd9   :  { %1741 = vmatprep.subr.msk.mxu0 %vm220_vm0, %v555_v10  ;;  %v1863_v22 = vpack.c.bf16 %v655_v21, %v654_v19  ;;  %v745_v23 = vld [vmem:[%s2624_s5] sm:$0xff]  ;;  %v1871_v26 = vpack.c.bf16 %v829_v25, %v828_v24  ;;  %v746_v40 = vld [vmem:[%s2624_s5 + $0x8] sm:$0xff]  ;;  %v1625_v41 = vld [vmem:[%s2624_s5 + $0x10] sm:$0xff]  ;;  %v2269_v21 = vmov 0.0   ;;  %p2221_p5 = scmp.lt.s32.totalorder %s1591_s25, %s1591_s25 }
  0xda   :  { %v1604_v27 = vld [vmem:[%s2623_s4] ss:$0 sm:$0xff]  ;;  %v831_v35 = vld [vmem:[#allocation9 + $0x18] sm:$0xff]  ;;  %v1626_v42 = vld [vmem:[%s2624_s5 + $0x18] sm:$0xff] }
  0xdb   :  { %v203_v2 = vld [vmem:[%s2648_s27] sm:$0xff]  ;;  %v204_v3 = vld [vmem:[%s2648_s27 + $0x8] sm:$0xff]  ;;  %v1001_v44 = vld [vmem:[#allocation9 + $0x28] sm:$0xff] }
  0xdc   :  { %1719 = vmatprep.mubr.msk.f32.mxu1 %vm213_vm1, %v203_v2  ;;  %v1851_v4 = vpack.c.bf16 %v204_v3, %v203_v2  ;;  %v830_v34 = vld [vmem:[#allocation9 + $0x10] sm:$0xff]  ;;  %v1000_v43 = vld [vmem:[#allocation9 + $0x20] sm:$0xff]  ;;  %v1003_v47 = vld [vmem:[#allocation9 + $0x38] sm:$0xff] }
  0xdd   :  { %1720 = vmatmul.mubr.msk.f32.vlgmr.msra.gmra.mrb[0].mxu1 %vm213_vm1, %v204_v3  ;;  %v1875_v38 = vpack.c.bf16 %v831_v35, %v830_v34  ;;  %v1883_v45 = vpack.c.bf16 %v1001_v44, %v1000_v43  ;;  %v1002_v46 = vld [vmem:[#allocation9 + $0x30] sm:$0xff]  ;;  %v1090_v54 = vld [vmem:[#allocation17 + $0x8] sm:$0xff]  ;;  %v1091_v55 = vld [vmem:[#allocation17 + $0x10] sm:$0xff] }
  0xde   :  { %1852 = vmatprep.subr.bf16.mxu1 %v1851_v4  ;;  %1726 = vmatprep.mubr.msk.f32.mxu1 %vm301_vm2, %v299_v5  ;;  %v1887_v50 = vpack.c.bf16 %v1003_v47, %v1002_v46  ;;  %v1089_v53 = vld [vmem:[#allocation17] sm:$0xff]  ;;  %v1092_v57 = vld [vmem:[#allocation17 + $0x18] sm:$0xff]  ;;  %v1175_v60 = vld [vmem:[#allocation20 + $0x8] sm:$0xff] }
  0xdf   :  { %1854 = vmatpush3.bf16.msra.mxu1 %v1851_v4  ;;  %v1891_v56 = vpack.c.bf16 %v1090_v54, %v1089_v53  ;;  %v1895_v58 = vpack.c.bf16 %v1092_v57, %v1091_v55  ;;  %v1174_v59 = vld [vmem:[#allocation20] sm:$0xff]  ;;  %v1618_v62 = vld [vmem:[#allocation12] ss:$0 sm:$0xff]  ;;  %v1176_v3 = vld [vmem:[#allocation20 + $0x10] sm:$0xff] }
  0xe0   :  { %1856 = vmatprep.subr.bf16.mxu1 %v1851_v4  ;;  %v1899_v61 = vpack.c.bf16 %v1175_v60, %v1174_v59  ;;  %v645_v9 = vld [vmem:[%s2630_s11 + $0x8] sm:$0xff]  ;;  %v651_v18 = vld [vmem:[#allocation18 + $0x18] sm:$0xff] }
  0xe1   :  { %v650_v17 = vld [vmem:[#allocation18 + $0x10] sm:$0xff] }
  0xe2   :  { %1727 = vmatmul.mubr.msk.f32.vlgmr.msra.gmra.mrb[2].mxu1 %vm301_vm2, %v300_v6  ;;  %v1919_v19 = vpack.c.bf16 %v651_v18, %v650_v17 }
  0xe3   :  { %1858 = vmatpush3.bf16.msra.mxu1 %v1851_v4  ;;  %1738 = vmatprep.mubr.msk.f32.mxu1 %vm301_vm2, %v471_v7  ;;  %v1177_v4 = vld [vmem:[#allocation20 + $0x18] sm:$0xff] }
  0xe4   :  { %1860 = vmatprep.subr.bf16.mxu1 %v1859_v20  ;;  %v1903_v6 = vpack.c.bf16 %v1177_v4, %v1176_v3 }
  0xe6   :  { %1739 = vmatmul.mubr.msk.f32.vlgmr.msra.gmra.mrb[4].mxu1 %vm301_vm2, %v472_v8  ;;  %v644_v8 = vld [vmem:[%s2630_s11] sm:$0xff] }
  0xe7   :  { %1862 = vmatpush3.bf16.msra.mxu1 %v1859_v20  ;;  %v2267_v20 = vmov 0.0|0.0  }
  0xe8   :  { %1864 = vmatprep.subr.bf16.mxu1 %v1863_v22 }
  0xeb   :  { %1866 = vmatpush3.bf16.msra.mxu1 %v1863_v22 }
  0xec   :  { %1872 = vmatprep.subr.bf16.mxu1 %v1871_v26 }
 0x1b0   :  { %v1721_v11 = vpop.f32.mrb[0].mxu1 }
 0x1b1   :  { %v290_v12 = vpop.f32.mrb[1].mxu1  ;;  %v296_v28 = vadd.f32 %v1721_v11, %v1604_v27  ;;  %v646_v11 = vld [vmem:[%s2630_s11 + $0x10] sm:$0xff] }
 0x1b2   :  { %v291_v29 = vadd.f32 %v1604_v27, %v290_v12  ;;  %v647_v12 = vld [vmem:[%s2630_s11 + $0x18] sm:$0xff] }
 0x1b5   :  { %v1728_v13 = vpop.f32.mrb[2].mxu1 }
 0x1b6   :  { %v374_v14 = vpop.f32.mrb[3].mxu1 }
 0x1b7   :  { %1731 = vmatprep.mubr.msk.f32.mxu0 %vm213_vm1, %v374_v14  ;;  %v648_v14 = vld [vmem:[#allocation18] sm:$0xff] }
 0x1b8   :  { %1732 = vmatmul.mubr.msk.f32.vlgmr.msra.gmra.mrb[0].mxu0 %vm213_vm1, %v1728_v13  ;;  %v1911_v13 = vpack.c.bf16 %v647_v12, %v646_v11 }
 0x1b9   :  { %1742 = vmatpush3.msk.msra.mxu0 %vm220_vm0, %v555_v10  ;;  %v1740_v15 = vpop.f32.mrb[4].mxu1  ;;  %v1907_v10 = vpack.c.bf16 %v645_v9, %v644_v8 }
 0x1ba   :  { %v545_v16 = vpop.f32.mrb[5].mxu1 }
 0x1bb   :  { %1743 = vmatprep.mubr.msk.f32.mxu0 %vm213_vm1, %v545_v16 }
 0x1c0   :  { %1744 = vmatmul.mubr.msk.f32.vlgmr.msra.gmra.mrb[0].mxu0 %vm213_vm1, %v1740_v15  ;;  %v649_v15 = vld [vmem:[#allocation18 + $0x8] sm:$0xff] }
 0x1c1   :  { %1761 = vmatprep.mubr.msk.f32.mxu0 %vm301_vm2, %v745_v23  ;;  %v1915_v16 = vpack.c.bf16 %v649_v15, %v648_v14 }
 0x293   :  { %v1745_v30 = vpop.f32.mrb[0].mxu0 }
 0x294   :  { %v1930_v31 = vadd.f32 %v1745_v30, %v296_v28  ;;  %v631_v32 = vpop.f32.mrb[1].mxu0  ;;  %v1404_v28 = vld [vmem:[#allocation15] sm:$0xff] }
 0x295   :  { %v1932_v33 = vadd.f32 %v631_v32, %v291_v29  ;;  %v1403_v29 = vld [vmem:[#allocation14] sm:$0xff] }
 0x296   :  { %1966 = vtanh.f32 %v1930_v31 }
 0x297   :  { %1968 = vtanh.f32 %v1932_v33  ;;  %v1641_v33 = vld [vmem:[%s2634_s15] ss:$0 sm:$0xff]  ;;  %s2216_s15 = scalar_lea.vmem %s1591_s25, 128 }
 0x298   :  { %p2217_p4 = scmp.ne.s32.totalorder %s1591_s25, %s2216_s15  ;;  %p2222_p6 = scmp.lt.s32.totalorder %s2216_s15, %s2216_s15 }
 0x29a   :  { %p2223_p7 = por %p2222_p6, %p2221_p5 }
 0x29c   :  { %p2224_p8 = pnand %p2223_p7, %p2217_p4 }
 0x2a0   :  { %v2549_v36 = vpop.eup %1966 }
 0x2a1   :  { %v2551_v37 = vpop.eup %1968 }
 0x2a2   :  { %1754 = vmatprep.mubr.msk.f32.mxu1 %vm663_vm3, %v2551_v37  ;;  %v1867_v39 = vpack.c.bf16 %v2549_v36, %v2551_v37 }
 0x2a3   :  { %1755 = vmatmul.mubr.msk.f32.vlgmr.msra.gmra.mrb[6].mxu1 %vm663_vm3, %v2549_v36 }
 0x2a4   :  { %1868 = vmatprep.subr.bf16.mxu0 %v1867_v39  ;;  %1874 = vmatpush3.bf16.msra.mxu1 %v1871_v26 }
 0x2a5   :  { %1870 = vmatpush3.bf16.msra.mxu0 %v1867_v39  ;;  %1876 = vmatprep.subr.bf16.mxu1 %v1875_v38 }
 0x2a6   :  { %1880 = vmatprep.subr.bf16.mxu0 %v1867_v39 }
 0x2a8   :  { %1762 = vmatmul.mubr.msk.f32.vlgmr.msra.gmra.mrb[2].mxu0 %vm301_vm2, %v746_v40  ;;  %1878 = vmatpush3.bf16.msra.mxu1 %v1875_v38  ;;  %v2270_v40 = vmov 0  }
 0x2a9   :  { %1882 = vmatpush3.bf16.msra.mxu0 %v1867_v39  ;;  %1779 = vmatprep.mubr.msk.f32.mxu0 %vm301_vm2, %v1625_v41  ;;  %v1643_v41 = vld [vmem:[#allocation2] ss:$0 sm:$0xff] }
 0x2aa   :  { %1884 = vmatprep.subr.bf16.mxu1 %v1883_v45  ;;  %1892 = vmatprep.subr.bf16.mxu0 %v1891_v56 }
 0x2ab   :  { %1965 = vset.pattern.permute.xlu0 %v2270_v40 }
 0x2ac   :  { %1780 = vmatmul.mubr.msk.f32.vlgmr.msra.gmra.mrb[4].mxu0 %vm301_vm2, %v1626_v42 }
 0x2ad   :  { %1894 = vmatpush3.bf16.msra.mxu0 %v1891_v56 }
 0x2ae   :  { %1896 = vmatprep.subr.bf16.mxu0 %v1895_v58 }
 0x2b1   :  { %1898 = vmatpush3.bf16.msra.mxu0 %v1895_v58 }
 0x2b2   :  { %1900 = vmatprep.subr.bf16.mxu0 %v1899_v61 }
 0x37b   :  { %v1763_v48 = vpop.f32.mrb[2].mxu0 }
 0x37c   :  { %v819_v49 = vpop.f32.mrb[3].mxu0 }
 0x37d   :  { %1772 = vmatprep.mubr.msk.f32.mxu1 %vm663_vm3, %v819_v49 }
 0x37e   :  { %1773 = vmatmul.mubr.msk.f32.vlgmr.msra.gmra.mrb[6].mxu1 %vm663_vm3, %v1763_v48 }
 0x37f   :  { %1886 = vmatpush3.bf16.msra.mxu1 %v1883_v45  ;;  %v1781_v51 = vpop.f32.mrb[4].mxu0 }
 0x380   :  { %1888 = vmatprep.subr.bf16.mxu1 %v1887_v50  ;;  %v990_v52 = vpop.f32.mrb[5].mxu0 }
 0x381   :  { %1790 = vmatprep.mubr.msk.f32.mxu1 %vm663_vm3, %v990_v52 }
 0x383   :  { %1890 = vmatpush3.bf16.msra.mxu1 %v1887_v50 }
 0x384   :  { %1923 = vmatprep.subr.bf16.mxu1 %v2267_v20 }
 0x386   :  { %1791 = vmatmul.mubr.msk.f32.vlgmr.msra.gmra.mrb[6].mxu1 %vm663_vm3, %v1781_v51 }
 0x387   :  { %1841 = vmatprep.mubr.msk.f32.mxu1 %vm2268_vm4, %v2269_v21 }
 0x459   :  { %v1792_v63 = vpop.f32.mrb[6].mxu1 }
 0x45a   :  { %v1933_v0 = vadd.f32 %v1792_v63, %v1618_v62  ;;  %v1076_v1 = vpop.f32.mrb[7].mxu1 }
 0x45b   :  { %v1934_v2 = vadd.f32 %v1618_v62, %v1076_v1 }
 0x45d   :  { %1970 = vtanh.f32 %v1934_v2 }
 0x45e   :  { %1972 = vtanh.f32 %v1933_v0 }
 0x467   :  { %v1971_v5 = vpop.eup %1970 }
 0x468   :  { %v1973_v7 = vpop.eup %1972  ;;  %1801 = vmatprep.mubr.msk.f32.mxu0 %vm663_vm3, %v1971_v5 }
 0x469   :  { %1802 = vmatmul.mubr.msk.f32.vlgmr.msra.gmra.mrb[6].mxu0 %vm663_vm3, %v1973_v7 }
 0x46a   :  { %1902 = vmatpush3.bf16.msra.mxu0 %v1899_v61  ;;  %1812 = vmatprep.mubr.msk.f32.mxu0 %vm663_vm3, %v1971_v5 }
 0x46b   :  { %1904 = vmatprep.subr.bf16.mxu0 %v1903_v6 }
 0x46e   :  { %1906 = vmatpush3.bf16.msra.mxu0 %v1903_v6 }
 0x46f   :  { %1908 = vmatprep.subr.bf16.mxu0 %v1907_v10 }
 0x471   :  { %1813 = vmatmul.mubr.msk.f32.vlgmr.msra.gmra.mrb[8].mxu0 %vm663_vm3, %v1973_v7 }
 0x472   :  { %1910 = vmatpush3.bf16.msra.mxu0 %v1907_v10  ;;  %1823 = vmatprep.mubr.msk.f32.mxu0 %vm663_vm3, %v2551_v37 }
 0x473   :  { %1912 = vmatprep.subr.bf16.mxu0 %v1911_v13 }
 0x476   :  { %1914 = vmatpush3.bf16.msra.mxu0 %v1911_v13 }
 0x477   :  { %1916 = vmatprep.subr.bf16.mxu0 %v1915_v16 }
 0x479   :  { %1824 = vmatmul.mubr.msk.f32.vlgmr.msra.gmra.mrb[6].mxu0 %vm663_vm3, %v2549_v36 }
 0x47a   :  { %1918 = vmatpush3.bf16.msra.mxu0 %v1915_v16  ;;  %1834 = vmatprep.mubr.msk.f32.mxu0 %vm663_vm3, %v2551_v37  ;;  %v1642_v37 = vld [vmem:[%s2635_s16] ss:$0 sm:$0xff] }
 0x47b   :  { %1920 = vmatprep.subr.bf16.mxu0 %v1919_v19 }
 0x47e   :  { %1922 = vmatpush3.bf16.msra.mxu0 %v1919_v19 }
 0x481   :  { %1835 = vmatmul.mubr.msk.f32.vlgmr.msra.gmra.mrb[8].mxu0 %vm663_vm3, %v2549_v36 }
 0x54c   :  { %v1825_v22 = vpop.f32.mrb[6].mxu0 }
 0x54d   :  { %v1319_v23 = vpop.f32.mrb[7].mxu0 }
 0x54e   :  { %v1927_v24 = vpack.c.bf16 %v1825_v22, %v1319_v23 }
 0x554   :  { %v1836_v25 = vpop.f32.mrb[8].mxu0 }
 0x555   :  { %v1394_v26 = vpop.f32.mrb[9].mxu0 }
 0x556   :  { %v1924_v27 = vpack.c.bf16 %v1836_v25, %v1394_v26 }
 0x558   :  { %1925 = vmatpush3.bf16.msra.mxu1 %v1924_v27 }
 0x559   :  { %1926 = vmatprep.subr.bf16.mxu1 %v2267_v20 }
 0x55b   :  { %1842 = vmatmul.mubr.msk.f32.vlgmr.msra.gmra.mrb[8].mxu1 %vm301_vm2, %v1404_v28 }
 0x55c   :  { %1928 = vmatpush3.bf16.msra.mxu1 %v1927_v24  ;;  %1848 = vmatprep.mubr.msk.f32.mxu1 %vm2268_vm4, %v2269_v21 }
 0x55f   :  { %1849 = vmatmul.mubr.msk.f32.vlgmr.msra.gmra.mrb[10].mxu1 %vm301_vm2, %v1403_v29 }
 0x62e   :  { %v1474_v30 = vpop.f32.mrb[8].mxu1 }
 0x62f   :  { %v1843_v31 = vpop.f32.mrb[9].mxu1 }
 0x632   :  { %v1547_v32 = vpop.f32.mrb[10].mxu1 }
 0x633   :  { %v1548_v34 = vadd.f32 %v1547_v32, %v1474_v30  ;;  %v1850_v35 = vpop.f32.mrb[11].mxu1 }
 0x635   :  { %v1558_v36 = vadd.f32 %v1641_v33, %v1548_v34 }
 0x637   :  { %v1559_v38 = vmax.f32 %v1558_v36, 0.0 }
 0x639   :  { %v1567_v39 = vmul.f32 %v1642_v37, %v1559_v38 }
 0x63b   :  { %1568 = vadd.xlane.f32.xlu0 %v1567_v39 }
 0x6c8   :  { %v1569_v42 = vpop.xlane.xlu0 %1568 }
 0x6c9   :  { %v1577_v43 = vadd.f32 %v1643_v41, %v1569_v42 }
 0x6cb   :  { %1580 = vperm.xlu0 %1965, %v1577_v43  }
 0x74a   :  { %v1581_v44 = vpop.permute.xlu0 %1580 }
 0x74b   :  { %1583 = vst [vmem:[#allocation21] sm:$0xff] %v1581_v44 }
 0x74c   :  { %2227 = shalt.err (!%p2224_p8)
}
 0x74d   :  { %s2649_s26 = sld [smem:[#allocation32_spill]] }
 0x753   :  { %s2228_s27 = scalar_lea.hbm %s2649_s26, 128 }
 0x754   :  { %p2229_p9 = scmp.ne.s32.totalorder %s2649_s26, %s2228_s27  ;;  %p2232_p10 = scmp.lt.u32.totalorder %s2228_s27, %s2649_s26 }
 0x756   :  { %p2234_p11 = pnand %p2232_p10, %p2229_p9 }
 0x758   :  { %2237 = shalt.err (!%p2234_p11)
}
 0x759   :  { %1593 = dma.vmem_to_hbm [thread:$0]  %s1591_s25, 128, %s2649_s26, [#allocation5]  }
 0x75a   :  { %2250 = dma.done.wait [#allocation5], 128  }
 0x75b   :  { %2251 = vsyncadd [#allocation5], 4294967168 }
 0x75c   :  { %1597 = vsyncpa [#allocation4], 1 }
 0x75d   :  { %1598 = vsyncpa [#allocation7], 1 }
 0x75e   :  { %1599 = vsyncpa [#allocation10], 1 }
 0x75f   :  { %1600 = vsyncpa [#allocation13], 1 }
 0x760   :  { %1601 = vsyncpa [#allocation16], 1 }
 0x761   :  { %1602 = vsyncpa [#allocation19], 1 }
 0x762   :  { %1603 = vsyncpa [#allocation5], 1 }

</bundles_post_ra>
